<compile_context>
chip_gen: v7x
topology: tpu7x:2x2x1
jax: 0.10.0
libtpu: 0.0.40
codegen_flags: <defaults>
</compile_context>

<pallas_src>
import math

import jax
import jax.numpy as jnp
from jax.experimental import pallas as pl
from jax.experimental.pallas import tpu as pltpu


_SUB_M = 8  # rows per register strip (one f32 sublane group)


def _hsg_kernel(x_ref, yt_ref, o_ref):
    # x_ref : (tm, D)  gathered points tile (resident across the N grid axis)
    # yt_ref: (D, tn)  transposed points tile (lane-dense)
    # o_ref : (tm, tn) output tile of the Hilbert distance matrix
    tm, D = x_ref.shape

    r = 0
    while r < tm:                           # static Python unroll over row strips
        rs = min(_SUB_M, tm - r)
        # d = 0 initializes the running extrema; remaining coords unrolled
        # (D = dim + 1 is small, e.g. 16).
        diff = x_ref[pl.ds(r, rs), 0:1] - yt_ref[0:1, :]      # (rs, tn)
        maxv = diff
        minv = diff
        for d in range(1, D):
            diff = x_ref[pl.ds(r, rs), d:d + 1] - yt_ref[d:d + 1, :]
            maxv = jnp.maximum(maxv, diff)
            minv = jnp.minimum(minv, diff)
        o_ref[pl.ds(r, rs), :] = maxv - minv                   # per-strip store
        r += rs


def _pick_tile(total, max_tile, quantum):
    """Largest tile <= max_tile that divides total and is a multiple of quantum.

    Falls back to the full extent (always legal for BlockSpec) if the array is
    small or no aligned divisor exists.
    """
    if total <= max_tile:
        return total
    t = (max_tile // quantum) * quantum
    while t >= quantum:
        if total % t == 0:
            return t
        t -= quantum
    return total


def hsg_forward(points, idx, *, tile_m=256, tile_n=1024):
    """Pallas implementation of HSG.forward(idx).

    points: (N, D) float32, D = dim + 1 simplex coordinates.
    idx   : (M,)   int32 indices into points.
    returns (M, N) float32 Hilbert distances.
    """
    x = points[idx]                          # gather (plain-JAX glue)
    M, D = x.shape
    N = points.shape[0]
    points_t = points.T                      # (D, N): lane-dense y layout

    tn = _pick_tile(N, tile_n, 128)          # lane axis: multiple of 128 (or full)
    tm = _pick_tile(M, tile_m, 8)            # sublane axis: multiple of 8 (or full)
    grid = (M // tm, N // tn)

    # VMEM budget: double-buffered out / y / x tiles (f32).  Kept well below
    # v7x's 64 MiB physical VMEM.
    est = 4 * (2 * tm * tn + 2 * D * tn + 2 * tm * D)
    vmem_limit = min(max(4 * est, 16 << 20), 48 << 20)

    cost = pl.CostEstimate(
        flops=3 * D * M * N,                 # one sub + max + min per (i, j, d)
        transcendentals=0,
        bytes_accessed=4 * (M * N + (M + N) * D),
    )

    return pl.pallas_call(
        _hsg_kernel,
        out_shape=jax.ShapeDtypeStruct((M, N), points.dtype),
        grid_spec=pltpu.PrefetchScalarGridSpec(
            num_scalar_prefetch=0,
            grid=grid,
            in_specs=[
                pl.BlockSpec((tm, D), lambda i, j: (i, 0)),    # x tile
                pl.BlockSpec((D, tn), lambda i, j: (0, j)),    # y^T tile
            ],
            out_specs=pl.BlockSpec((tm, tn), lambda i, j: (i, j)),
        ),
        compiler_params=pltpu.CompilerParams(
            dimension_semantics=("parallel", "parallel"),
            vmem_limit_bytes=vmem_limit,
        ),
        cost_estimate=cost,
    )(x, points_t)


def _reference(points, idx):
    x = points[idx]
    diff = x[:, None, :] - points[None, :, :]
    return jnp.max(diff, axis=2) - jnp.min(diff, axis=2)


if __name__ == "__main__":
    # Deterministic Gaussian init mirroring randompoints(n, dim + 1):
    #   Normal(0, stdv) with stdv = 1/sqrt(dim+1)  (HSG uses dim+1 coordinates)
    n, dim = 512, 15
    D = dim + 1
    key = jax.random.PRNGKey(0)
    k_pts, k_idx = jax.random.split(key)
    stdv = 1.0 / math.sqrt(D)
    points = stdv * jax.random.normal(k_pts, (n, D), dtype=jnp.float32)

    # A small batch of indices (M = 16)
    idx = jax.random.randint(k_idx, (16,), 0, n)

    out = jax.block_until_ready(hsg_forward(points, idx))

    ref = _reference(points, idx)
    if not jnp.allclose(out, ref, atol=1e-5, rtol=1e-5):
        raise AssertionError("Pallas HSG kernel mismatch vs reference")

    print("KERNEL_OK")
</pallas_src>

<mosaic_0001>
module attributes {stable_mosaic.version = 11 : i64} {
  func.func @_hsg_kernel(%arg0: i32, %arg1: i32, %arg2: memref<16x16xf32, #tpu.memory_space<vmem>>, %arg3: memref<16x512xf32, #tpu.memory_space<vmem>>, %arg4: memref<16x512xf32, #tpu.memory_space<vmem>>) attributes {dimension_semantics = [#tpu.dimension_semantics<parallel>, #tpu.dimension_semantics<parallel>], iteration_bounds = array<i64: 1, 1>, scalar_prefetch = 0 : i64, scratch_operands = 0 : i64, tpu.core_type = #tpu.core_type<tc>, window_params = [{transform_indices = @transform_0, window_bounds = array<i64: 16, 16>}, {transform_indices = @transform_1, window_bounds = array<i64: 16, 512>}, {transform_indices = @transform_2, window_bounds = array<i64: 16, 512>}]} {
    %c0 = arith.constant 0 : index
    %c0_0 = arith.constant 0 : index
    %0 = vector.load %arg2[%c0, %c0_0] : memref<16x16xf32, #tpu.memory_space<vmem>>, vector<8x1xf32>
    %c0_1 = arith.constant 0 : index
    %c0_2 = arith.constant 0 : index
    %1 = vector.load %arg3[%c0_1, %c0_2] : memref<16x512xf32, #tpu.memory_space<vmem>>, vector<1x512xf32>
    %2 = vector.broadcast %0 : vector<8x1xf32> to vector<8x512xf32>
    %3 = vector.broadcast %1 : vector<1x512xf32> to vector<8x512xf32>
    %4 = arith.subf %2, %3 : vector<8x512xf32>
    %c0_3 = arith.constant 0 : index
    %c1 = arith.constant 1 : index
    %5 = vector.load %arg2[%c0_3, %c1] : memref<16x16xf32, #tpu.memory_space<vmem>>, vector<8x1xf32>
    %c1_4 = arith.constant 1 : index
    %c0_5 = arith.constant 0 : index
    %6 = vector.load %arg3[%c1_4, %c0_5] : memref<16x512xf32, #tpu.memory_space<vmem>>, vector<1x512xf32>
    %7 = vector.broadcast %5 : vector<8x1xf32> to vector<8x512xf32>
    %8 = vector.broadcast %6 : vector<1x512xf32> to vector<8x512xf32>
    %9 = arith.subf %7, %8 : vector<8x512xf32>
    %10 = arith.maximumf %4, %9 : vector<8x512xf32>
    %11 = arith.minimumf %4, %9 : vector<8x512xf32>
    %c0_6 = arith.constant 0 : index
    %c2 = arith.constant 2 : index
    %12 = vector.load %arg2[%c0_6, %c2] : memref<16x16xf32, #tpu.memory_space<vmem>>, vector<8x1xf32>
    %c2_7 = arith.constant 2 : index
    %c0_8 = arith.constant 0 : index
    %13 = vector.load %arg3[%c2_7, %c0_8] : memref<16x512xf32, #tpu.memory_space<vmem>>, vector<1x512xf32>
    %14 = vector.broadcast %12 : vector<8x1xf32> to vector<8x512xf32>
    %15 = vector.broadcast %13 : vector<1x512xf32> to vector<8x512xf32>
    %16 = arith.subf %14, %15 : vector<8x512xf32>
    %17 = arith.maximumf %10, %16 : vector<8x512xf32>
    %18 = arith.minimumf %11, %16 : vector<8x512xf32>
    %c0_9 = arith.constant 0 : index
    %c3 = arith.constant 3 : index
    %19 = vector.load %arg2[%c0_9, %c3] : memref<16x16xf32, #tpu.memory_space<vmem>>, vector<8x1xf32>
    %c3_10 = arith.constant 3 : index
    %c0_11 = arith.constant 0 : index
    %20 = vector.load %arg3[%c3_10, %c0_11] : memref<16x512xf32, #tpu.memory_space<vmem>>, vector<1x512xf32>
    %21 = vector.broadcast %19 : vector<8x1xf32> to vector<8x512xf32>
    %22 = vector.broadcast %20 : vector<1x512xf32> to vector<8x512xf32>
    %23 = arith.subf %21, %22 : vector<8x512xf32>
    %24 = arith.maximumf %17, %23 : vector<8x512xf32>
    %25 = arith.minimumf %18, %23 : vector<8x512xf32>
    %c0_12 = arith.constant 0 : index
    %c4 = arith.constant 4 : index
    %26 = vector.load %arg2[%c0_12, %c4] : memref<16x16xf32, #tpu.memory_space<vmem>>, vector<8x1xf32>
    %c4_13 = arith.constant 4 : index
    %c0_14 = arith.constant 0 : index
    %27 = vector.load %arg3[%c4_13, %c0_14] : memref<16x512xf32, #tpu.memory_space<vmem>>, vector<1x512xf32>
    %28 = vector.broadcast %26 : vector<8x1xf32> to vector<8x512xf32>
    %29 = vector.broadcast %27 : vector<1x512xf32> to vector<8x512xf32>
    %30 = arith.subf %28, %29 : vector<8x512xf32>
    %31 = arith.maximumf %24, %30 : vector<8x512xf32>
    %32 = arith.minimumf %25, %30 : vector<8x512xf32>
    %c0_15 = arith.constant 0 : index
    %c5 = arith.constant 5 : index
    %33 = vector.load %arg2[%c0_15, %c5] : memref<16x16xf32, #tpu.memory_space<vmem>>, vector<8x1xf32>
    %c5_16 = arith.constant 5 : index
    %c0_17 = arith.constant 0 : index
    %34 = vector.load %arg3[%c5_16, %c0_17] : memref<16x512xf32, #tpu.memory_space<vmem>>, vector<1x512xf32>
    %35 = vector.broadcast %33 : vector<8x1xf32> to vector<8x512xf32>
    %36 = vector.broadcast %34 : vector<1x512xf32> to vector<8x512xf32>
    %37 = arith.subf %35, %36 : vector<8x512xf32>
    %38 = arith.maximumf %31, %37 : vector<8x512xf32>
    %39 = arith.minimumf %32, %37 : vector<8x512xf32>
    %c0_18 = arith.constant 0 : index
    %c6 = arith.constant 6 : index
    %40 = vector.load %arg2[%c0_18, %c6] : memref<16x16xf32, #tpu.memory_space<vmem>>, vector<8x1xf32>
    %c6_19 = arith.constant 6 : index
    %c0_20 = arith.constant 0 : index
    %41 = vector.load %arg3[%c6_19, %c0_20] : memref<16x512xf32, #tpu.memory_space<vmem>>, vector<1x512xf32>
    %42 = vector.broadcast %40 : vector<8x1xf32> to vector<8x512xf32>
    %43 = vector.broadcast %41 : vector<1x512xf32> to vector<8x512xf32>
    %44 = arith.subf %42, %43 : vector<8x512xf32>
    %45 = arith.maximumf %38, %44 : vector<8x512xf32>
    %46 = arith.minimumf %39, %44 : vector<8x512xf32>
    %c0_21 = arith.constant 0 : index
    %c7 = arith.constant 7 : index
    %47 = vector.load %arg2[%c0_21, %c7] : memref<16x16xf32, #tpu.memory_space<vmem>>, vector<8x1xf32>
    %c7_22 = arith.constant 7 : index
    %c0_23 = arith.constant 0 : index
    %48 = vector.load %arg3[%c7_22, %c0_23] : memref<16x512xf32, #tpu.memory_space<vmem>>, vector<1x512xf32>
    %49 = vector.broadcast %47 : vector<8x1xf32> to vector<8x512xf32>
    %50 = vector.broadcast %48 : vector<1x512xf32> to vector<8x512xf32>
    %51 = arith.subf %49, %50 : vector<8x512xf32>
    %52 = arith.maximumf %45, %51 : vector<8x512xf32>
    %53 = arith.minimumf %46, %51 : vector<8x512xf32>
    %c0_24 = arith.constant 0 : index
    %c8 = arith.constant 8 : index
    %54 = vector.load %arg2[%c0_24, %c8] : memref<16x16xf32, #tpu.memory_space<vmem>>, vector<8x1xf32>
    %c8_25 = arith.constant 8 : index
    %c0_26 = arith.constant 0 : index
    %55 = vector.load %arg3[%c8_25, %c0_26] : memref<16x512xf32, #tpu.memory_space<vmem>>, vector<1x512xf32>
    %56 = vector.broadcast %54 : vector<8x1xf32> to vector<8x512xf32>
    %57 = vector.broadcast %55 : vector<1x512xf32> to vector<8x512xf32>
    %58 = arith.subf %56, %57 : vector<8x512xf32>
    %59 = arith.maximumf %52, %58 : vector<8x512xf32>
    %60 = arith.minimumf %53, %58 : vector<8x512xf32>
    %c0_27 = arith.constant 0 : index
    %c9 = arith.constant 9 : index
    %61 = vector.load %arg2[%c0_27, %c9] : memref<16x16xf32, #tpu.memory_space<vmem>>, vector<8x1xf32>
    %c9_28 = arith.constant 9 : index
    %c0_29 = arith.constant 0 : index
    %62 = vector.load %arg3[%c9_28, %c0_29] : memref<16x512xf32, #tpu.memory_space<vmem>>, vector<1x512xf32>
    %63 = vector.broadcast %61 : vector<8x1xf32> to vector<8x512xf32>
    %64 = vector.broadcast %62 : vector<1x512xf32> to vector<8x512xf32>
    %65 = arith.subf %63, %64 : vector<8x512xf32>
    %66 = arith.maximumf %59, %65 : vector<8x512xf32>
    %67 = arith.minimumf %60, %65 : vector<8x512xf32>
    %c0_30 = arith.constant 0 : index
    %c10 = arith.constant 10 : index
    %68 = vector.load %arg2[%c0_30, %c10] : memref<16x16xf32, #tpu.memory_space<vmem>>, vector<8x1xf32>
    %c10_31 = arith.constant 10 : index
    %c0_32 = arith.constant 0 : index
    %69 = vector.load %arg3[%c10_31, %c0_32] : memref<16x512xf32, #tpu.memory_space<vmem>>, vector<1x512xf32>
    %70 = vector.broadcast %68 : vector<8x1xf32> to vector<8x512xf32>
    %71 = vector.broadcast %69 : vector<1x512xf32> to vector<8x512xf32>
    %72 = arith.subf %70, %71 : vector<8x512xf32>
    %73 = arith.maximumf %66, %72 : vector<8x512xf32>
    %74 = arith.minimumf %67, %72 : vector<8x512xf32>
    %c0_33 = arith.constant 0 : index
    %c11 = arith.constant 11 : index
    %75 = vector.load %arg2[%c0_33, %c11] : memref<16x16xf32, #tpu.memory_space<vmem>>, vector<8x1xf32>
    %c11_34 = arith.constant 11 : index
    %c0_35 = arith.constant 0 : index
    %76 = vector.load %arg3[%c11_34, %c0_35] : memref<16x512xf32, #tpu.memory_space<vmem>>, vector<1x512xf32>
    %77 = vector.broadcast %75 : vector<8x1xf32> to vector<8x512xf32>
    %78 = vector.broadcast %76 : vector<1x512xf32> to vector<8x512xf32>
    %79 = arith.subf %77, %78 : vector<8x512xf32>
    %80 = arith.maximumf %73, %79 : vector<8x512xf32>
    %81 = arith.minimumf %74, %79 : vector<8x512xf32>
    %c0_36 = arith.constant 0 : index
    %c12 = arith.constant 12 : index
    %82 = vector.load %arg2[%c0_36, %c12] : memref<16x16xf32, #tpu.memory_space<vmem>>, vector<8x1xf32>
    %c12_37 = arith.constant 12 : index
    %c0_38 = arith.constant 0 : index
    %83 = vector.load %arg3[%c12_37, %c0_38] : memref<16x512xf32, #tpu.memory_space<vmem>>, vector<1x512xf32>
    %84 = vector.broadcast %82 : vector<8x1xf32> to vector<8x512xf32>
    %85 = vector.broadcast %83 : vector<1x512xf32> to vector<8x512xf32>
    %86 = arith.subf %84, %85 : vector<8x512xf32>
    %87 = arith.maximumf %80, %86 : vector<8x512xf32>
    %88 = arith.minimumf %81, %86 : vector<8x512xf32>
    %c0_39 = arith.constant 0 : index
    %c13 = arith.constant 13 : index
    %89 = vector.load %arg2[%c0_39, %c13] : memref<16x16xf32, #tpu.memory_space<vmem>>, vector<8x1xf32>
    %c13_40 = arith.constant 13 : index
    %c0_41 = arith.constant 0 : index
    %90 = vector.load %arg3[%c13_40, %c0_41] : memref<16x512xf32, #tpu.memory_space<vmem>>, vector<1x512xf32>
    %91 = vector.broadcast %89 : vector<8x1xf32> to vector<8x512xf32>
    %92 = vector.broadcast %90 : vector<1x512xf32> to vector<8x512xf32>
    %93 = arith.subf %91, %92 : vector<8x512xf32>
    %94 = arith.maximumf %87, %93 : vector<8x512xf32>
    %95 = arith.minimumf %88, %93 : vector<8x512xf32>
    %c0_42 = arith.constant 0 : index
    %c14 = arith.constant 14 : index
    %96 = vector.load %arg2[%c0_42, %c14] : memref<16x16xf32, #tpu.memory_space<vmem>>, vector<8x1xf32>
    %c14_43 = arith.constant 14 : index
    %c0_44 = arith.constant 0 : index
    %97 = vector.load %arg3[%c14_43, %c0_44] : memref<16x512xf32, #tpu.memory_space<vmem>>, vector<1x512xf32>
    %98 = vector.broadcast %96 : vector<8x1xf32> to vector<8x512xf32>
    %99 = vector.broadcast %97 : vector<1x512xf32> to vector<8x512xf32>
    %100 = arith.subf %98, %99 : vector<8x512xf32>
    %101 = arith.maximumf %94, %100 : vector<8x512xf32>
    %102 = arith.minimumf %95, %100 : vector<8x512xf32>
    %c0_45 = arith.constant 0 : index
    %c15 = arith.constant 15 : index
    %103 = vector.load %arg2[%c0_45, %c15] : memref<16x16xf32, #tpu.memory_space<vmem>>, vector<8x1xf32>
    %c15_46 = arith.constant 15 : index
    %c0_47 = arith.constant 0 : index
    %104 = vector.load %arg3[%c15_46, %c0_47] : memref<16x512xf32, #tpu.memory_space<vmem>>, vector<1x512xf32>
    %105 = vector.broadcast %103 : vector<8x1xf32> to vector<8x512xf32>
    %106 = vector.broadcast %104 : vector<1x512xf32> to vector<8x512xf32>
    %107 = arith.subf %105, %106 : vector<8x512xf32>
    %108 = arith.maximumf %101, %107 : vector<8x512xf32>
    %109 = arith.minimumf %102, %107 : vector<8x512xf32>
    %110 = arith.subf %108, %109 : vector<8x512xf32>
    %c0_48 = arith.constant 0 : index
    %c0_49 = arith.constant 0 : index
    %111 = vector.load %arg4[%c0_48, %c0_49] : memref<16x512xf32, #tpu.memory_space<vmem>>, vector<8x512xf32>
    tpu.vector_store %arg4[%c0_48, %c0_49], %110 {strides = array<i32>} : memref<16x512xf32, #tpu.memory_space<vmem>>, vector<8x512xf32>,
    %c8_50 = arith.constant 8 : index
    %c0_51 = arith.constant 0 : index
    %112 = vector.load %arg2[%c8_50, %c0_51] : memref<16x16xf32, #tpu.memory_space<vmem>>, vector<8x1xf32>
    %c0_52 = arith.constant 0 : index
    %c0_53 = arith.constant 0 : index
    %113 = vector.load %arg3[%c0_52, %c0_53] : memref<16x512xf32, #tpu.memory_space<vmem>>, vector<1x512xf32>
    %114 = vector.broadcast %112 : vector<8x1xf32> to vector<8x512xf32>
    %115 = vector.broadcast %113 : vector<1x512xf32> to vector<8x512xf32>
    %116 = arith.subf %114, %115 : vector<8x512xf32>
    %c8_54 = arith.constant 8 : index
    %c1_55 = arith.constant 1 : index
    %117 = vector.load %arg2[%c8_54, %c1_55] : memref<16x16xf32, #tpu.memory_space<vmem>>, vector<8x1xf32>
    %c1_56 = arith.constant 1 : index
    %c0_57 = arith.constant 0 : index
    %118 = vector.load %arg3[%c1_56, %c0_57] : memref<16x512xf32, #tpu.memory_space<vmem>>, vector<1x512xf32>
    %119 = vector.broadcast %117 : vector<8x1xf32> to vector<8x512xf32>
    %120 = vector.broadcast %118 : vector<1x512xf32> to vector<8x512xf32>
    %121 = arith.subf %119, %120 : vector<8x512xf32>
    %122 = arith.maximumf %116, %121 : vector<8x512xf32>
    %123 = arith.minimumf %116, %121 : vector<8x512xf32>
    %c8_58 = arith.constant 8 : index
    %c2_59 = arith.constant 2 : index
    %124 = vector.load %arg2[%c8_58, %c2_59] : memref<16x16xf32, #tpu.memory_space<vmem>>, vector<8x1xf32>
    %c2_60 = arith.constant 2 : index
    %c0_61 = arith.constant 0 : index
    %125 = vector.load %arg3[%c2_60, %c0_61] : memref<16x512xf32, #tpu.memory_space<vmem>>, vector<1x512xf32>
    %126 = vector.broadcast %124 : vector<8x1xf32> to vector<8x512xf32>
    %127 = vector.broadcast %125 : vector<1x512xf32> to vector<8x512xf32>
    %128 = arith.subf %126, %127 : vector<8x512xf32>
    %129 = arith.maximumf %122, %128 : vector<8x512xf32>
    %130 = arith.minimumf %123, %128 : vector<8x512xf32>
    %c8_62 = arith.constant 8 : index
    %c3_63 = arith.constant 3 : index
    %131 = vector.load %arg2[%c8_62, %c3_63] : memref<16x16xf32, #tpu.memory_space<vmem>>, vector<8x1xf32>
    %c3_64 = arith.constant 3 : index
    %c0_65 = arith.constant 0 : index
    %132 = vector.load %arg3[%c3_64, %c0_65] : memref<16x512xf32, #tpu.memory_space<vmem>>, vector<1x512xf32>
    %133 = vector.broadcast %131 : vector<8x1xf32> to vector<8x512xf32>
    %134 = vector.broadcast %132 : vector<1x512xf32> to vector<8x512xf32>
    %135 = arith.subf %133, %134 : vector<8x512xf32>
    %136 = arith.maximumf %129, %135 : vector<8x512xf32>
    %137 = arith.minimumf %130, %135 : vector<8x512xf32>
    %c8_66 = arith.constant 8 : index
    %c4_67 = arith.constant 4 : index
    %138 = vector.load %arg2[%c8_66, %c4_67] : memref<16x16xf32, #tpu.memory_space<vmem>>, vector<8x1xf32>
    %c4_68 = arith.constant 4 : index
    %c0_69 = arith.constant 0 : index
    %139 = vector.load %arg3[%c4_68, %c0_69] : memref<16x512xf32, #tpu.memory_space<vmem>>, vector<1x512xf32>
    %140 = vector.broadcast %138 : vector<8x1xf32> to vector<8x512xf32>
    %141 = vector.broadcast %139 : vector<1x512xf32> to vector<8x512xf32>
    %142 = arith.subf %140, %141 : vector<8x512xf32>
    %143 = arith.maximumf %136, %142 : vector<8x512xf32>
    %144 = arith.minimumf %137, %142 : vector<8x512xf32>
    %c8_70 = arith.constant 8 : index
    %c5_71 = arith.constant 5 : index
    %145 = vector.load %arg2[%c8_70, %c5_71] : memref<16x16xf32, #tpu.memory_space<vmem>>, vector<8x1xf32>
    %c5_72 = arith.constant 5 : index
    %c0_73 = arith.constant 0 : index
    %146 = vector.load %arg3[%c5_72, %c0_73] : memref<16x512xf32, #tpu.memory_space<vmem>>, vector<1x512xf32>
    %147 = vector.broadcast %145 : vector<8x1xf32> to vector<8x512xf32>
    %148 = vector.broadcast %146 : vector<1x512xf32> to vector<8x512xf32>
    %149 = arith.subf %147, %148 : vector<8x512xf32>
    %150 = arith.maximumf %143, %149 : vector<8x512xf32>
    %151 = arith.minimumf %144, %149 : vector<8x512xf32>
    %c8_74 = arith.constant 8 : index
    %c6_75 = arith.constant 6 : index
    %152 = vector.load %arg2[%c8_74, %c6_75] : memref<16x16xf32, #tpu.memory_space<vmem>>, vector<8x1xf32>
    %c6_76 = arith.constant 6 : index
    %c0_77 = arith.constant 0 : index
    %153 = vector.load %arg3[%c6_76, %c0_77] : memref<16x512xf32, #tpu.memory_space<vmem>>, vector<1x512xf32>
    %154 = vector.broadcast %152 : vector<8x1xf32> to vector<8x512xf32>
    %155 = vector.broadcast %153 : vector<1x512xf32> to vector<8x512xf32>
    %156 = arith.subf %154, %155 : vector<8x512xf32>
    %157 = arith.maximumf %150, %156 : vector<8x512xf32>
    %158 = arith.minimumf %151, %156 : vector<8x512xf32>
    %c8_78 = arith.constant 8 : index
    %c7_79 = arith.constant 7 : index
    %159 = vector.load %arg2[%c8_78, %c7_79] : memref<16x16xf32, #tpu.memory_space<vmem>>, vector<8x1xf32>
    %c7_80 = arith.constant 7 : index
    %c0_81 = arith.constant 0 : index
    %160 = vector.load %arg3[%c7_80, %c0_81] : memref<16x512xf32, #tpu.memory_space<vmem>>, vector<1x512xf32>
    %161 = vector.broadcast %159 : vector<8x1xf32> to vector<8x512xf32>
    %162 = vector.broadcast %160 : vector<1x512xf32> to vector<8x512xf32>
    %163 = arith.subf %161, %162 : vector<8x512xf32>
    %164 = arith.maximumf %157, %163 : vector<8x512xf32>
    %165 = arith.minimumf %158, %163 : vector<8x512xf32>
    %c8_82 = arith.constant 8 : index
    %c8_83 = arith.constant 8 : index
    %166 = vector.load %arg2[%c8_82, %c8_83] : memref<16x16xf32, #tpu.memory_space<vmem>>, vector<8x1xf32>
    %c8_84 = arith.constant 8 : index
    %c0_85 = arith.constant 0 : index
    %167 = vector.load %arg3[%c8_84, %c0_85] : memref<16x512xf32, #tpu.memory_space<vmem>>, vector<1x512xf32>
    %168 = vector.broadcast %166 : vector<8x1xf32> to vector<8x512xf32>
    %169 = vector.broadcast %167 : vector<1x512xf32> to vector<8x512xf32>
    %170 = arith.subf %168, %169 : vector<8x512xf32>
    %171 = arith.maximumf %164, %170 : vector<8x512xf32>
    %172 = arith.minimumf %165, %170 : vector<8x512xf32>
    %c8_86 = arith.constant 8 : index
    %c9_87 = arith.constant 9 : index
    %173 = vector.load %arg2[%c8_86, %c9_87] : memref<16x16xf32, #tpu.memory_space<vmem>>, vector<8x1xf32>
    %c9_88 = arith.constant 9 : index
    %c0_89 = arith.constant 0 : index
    %174 = vector.load %arg3[%c9_88, %c0_89] : memref<16x512xf32, #tpu.memory_space<vmem>>, vector<1x512xf32>
    %175 = vector.broadcast %173 : vector<8x1xf32> to vector<8x512xf32>
    %176 = vector.broadcast %174 : vector<1x512xf32> to vector<8x512xf32>
    %177 = arith.subf %175, %176 : vector<8x512xf32>
    %178 = arith.maximumf %171, %177 : vector<8x512xf32>
    %179 = arith.minimumf %172, %177 : vector<8x512xf32>
    %c8_90 = arith.constant 8 : index
    %c10_91 = arith.constant 10 : index
    %180 = vector.load %arg2[%c8_90, %c10_91] : memref<16x16xf32, #tpu.memory_space<vmem>>, vector<8x1xf32>
    %c10_92 = arith.constant 10 : index
    %c0_93 = arith.constant 0 : index
    %181 = vector.load %arg3[%c10_92, %c0_93] : memref<16x512xf32, #tpu.memory_space<vmem>>, vector<1x512xf32>
    %182 = vector.broadcast %180 : vector<8x1xf32> to vector<8x512xf32>
    %183 = vector.broadcast %181 : vector<1x512xf32> to vector<8x512xf32>
    %184 = arith.subf %182, %183 : vector<8x512xf32>
    %185 = arith.maximumf %178, %184 : vector<8x512xf32>
    %186 = arith.minimumf %179, %184 : vector<8x512xf32>
    %c8_94 = arith.constant 8 : index
    %c11_95 = arith.constant 11 : index
    %187 = vector.load %arg2[%c8_94, %c11_95] : memref<16x16xf32, #tpu.memory_space<vmem>>, vector<8x1xf32>
    %c11_96 = arith.constant 11 : index
    %c0_97 = arith.constant 0 : index
    %188 = vector.load %arg3[%c11_96, %c0_97] : memref<16x512xf32, #tpu.memory_space<vmem>>, vector<1x512xf32>
    %189 = vector.broadcast %187 : vector<8x1xf32> to vector<8x512xf32>
    %190 = vector.broadcast %188 : vector<1x512xf32> to vector<8x512xf32>
    %191 = arith.subf %189, %190 : vector<8x512xf32>
    %192 = arith.maximumf %185, %191 : vector<8x512xf32>
    %193 = arith.minimumf %186, %191 : vector<8x512xf32>
    %c8_98 = arith.constant 8 : index
    %c12_99 = arith.constant 12 : index
    %194 = vector.load %arg2[%c8_98, %c12_99] : memref<16x16xf32, #tpu.memory_space<vmem>>, vector<8x1xf32>
    %c12_100 = arith.constant 12 : index
    %c0_101 = arith.constant 0 : index
    %195 = vector.load %arg3[%c12_100, %c0_101] : memref<16x512xf32, #tpu.memory_space<vmem>>, vector<1x512xf32>
    %196 = vector.broadcast %194 : vector<8x1xf32> to vector<8x512xf32>
    %197 = vector.broadcast %195 : vector<1x512xf32> to vector<8x512xf32>
    %198 = arith.subf %196, %197 : vector<8x512xf32>
    %199 = arith.maximumf %192, %198 : vector<8x512xf32>
    %200 = arith.minimumf %193, %198 : vector<8x512xf32>
    %c8_102 = arith.constant 8 : index
    %c13_103 = arith.constant 13 : index
    %201 = vector.load %arg2[%c8_102, %c13_103] : memref<16x16xf32, #tpu.memory_space<vmem>>, vector<8x1xf32>
    %c13_104 = arith.constant 13 : index
    %c0_105 = arith.constant 0 : index
    %202 = vector.load %arg3[%c13_104, %c0_105] : memref<16x512xf32, #tpu.memory_space<vmem>>, vector<1x512xf32>
    %203 = vector.broadcast %201 : vector<8x1xf32> to vector<8x512xf32>
    %204 = vector.broadcast %202 : vector<1x512xf32> to vector<8x512xf32>
    %205 = arith.subf %203, %204 : vector<8x512xf32>
    %206 = arith.maximumf %199, %205 : vector<8x512xf32>
    %207 = arith.minimumf %200, %205 : vector<8x512xf32>
    %c8_106 = arith.constant 8 : index
    %c14_107 = arith.constant 14 : index
    %208 = vector.load %arg2[%c8_106, %c14_107] : memref<16x16xf32, #tpu.memory_space<vmem>>, vector<8x1xf32>
    %c14_108 = arith.constant 14 : index
    %c0_109 = arith.constant 0 : index
    %209 = vector.load %arg3[%c14_108, %c0_109] : memref<16x512xf32, #tpu.memory_space<vmem>>, vector<1x512xf32>
    %210 = vector.broadcast %208 : vector<8x1xf32> to vector<8x512xf32>
    %211 = vector.broadcast %209 : vector<1x512xf32> to vector<8x512xf32>
    %212 = arith.subf %210, %211 : vector<8x512xf32>
    %213 = arith.maximumf %206, %212 : vector<8x512xf32>
    %214 = arith.minimumf %207, %212 : vector<8x512xf32>
    %c8_110 = arith.constant 8 : index
    %c15_111 = arith.constant 15 : index
    %215 = vector.load %arg2[%c8_110, %c15_111] : memref<16x16xf32, #tpu.memory_space<vmem>>, vector<8x1xf32>
    %c15_112 = arith.constant 15 : index
    %c0_113 = arith.constant 0 : index
    %216 = vector.load %arg3[%c15_112, %c0_113] : memref<16x512xf32, #tpu.memory_space<vmem>>, vector<1x512xf32>
    %217 = vector.broadcast %215 : vector<8x1xf32> to vector<8x512xf32>
    %218 = vector.broadcast %216 : vector<1x512xf32> to vector<8x512xf32>
    %219 = arith.subf %217, %218 : vector<8x512xf32>
    %220 = arith.maximumf %213, %219 : vector<8x512xf32>
    %221 = arith.minimumf %214, %219 : vector<8x512xf32>
    %222 = arith.subf %220, %221 : vector<8x512xf32>
    %c8_114 = arith.constant 8 : index
    %c0_115 = arith.constant 0 : index
    %223 = vector.load %arg4[%c8_114, %c0_115] : memref<16x512xf32, #tpu.memory_space<vmem>>, vector<8x512xf32>
    tpu.vector_store %arg4[%c8_114, %c0_115], %222 {strides = array<i32>} : memref<16x512xf32, #tpu.memory_space<vmem>>, vector<8x512xf32>,
    return
  }
  func.func @transform_0(%arg0: i32, %arg1: i32) -> (i32, i32) {
    %c0_i32 = arith.constant 0 : i32
    %c0_i32_0 = arith.constant 0 : i32
    return %arg0, %c0_i32 : i32, i32
  }
  func.func @transform_1(%arg0: i32, %arg1: i32) -> (i32, i32) {
    %c0_i32 = arith.constant 0 : i32
    %c0_i32_0 = arith.constant 0 : i32
    return %c0_i32, %arg1 : i32, i32
  }
  func.func @transform_2(%arg0: i32, %arg1: i32) -> (i32, i32) {
    %c0_i32 = arith.constant 0 : i32
    return %arg0, %arg1 : i32, i32
  }
}

</mosaic_0001>

<bundles_post_ra>
// kernel: tpu_custom_call.1
= control target key start
LH: loop header
LB: loop body
LE: loop exit
PB: predicated region body
PF: predicated region fallthrough
CT: control target
= control target key end

     0   :  { %7 = vsyncpa [#allocation3], 0  ;;  %s2365_s0 = inlined_call_operand.hbm [shape: f32[16,16], index: 0, kind: input, shape index: {}]   ;;  %s2366_s1 = inlined_call_operand.hbm [shape: f32[16,512], index: 1, kind: input, shape index: {}]   ;;  %s2367_s2 = inlined_call_operand.hbm [shape: f32[16,512], index: 2, kind: output, shape index: {}]  }
   0x1   :  { %8 = vsyncpa [#allocation6], 0 }
   0x2   :  { %9 = vsyncpa [#allocation4], 0  ;;  %s1417_s9 = smov [#allocation2]   ;;  %s1345_s13 = scalar_lea.hbm %s2365_s0, 256 }
   0x3   :  { %s15_s10 = sshll.u32 %s1417_s9, 4  ;;  %p1346_p0 = scmp.ne.s32.totalorder %s2365_s0, %s1345_s13  ;;  %s16_s10 = int_to_ptr.vmem [resolvable:$true] %s15_s10 }
   0x4   :  { %p1349_p1 = scmp.lt.u32.totalorder %s1345_s13, %s2365_s0 }
   0x6   :  { %p1351_p2 = pnand %p1349_p1, %p1346_p0 }
   0x8   :  { %1354 = shalt.err (!%p1351_p2)
}
   0x9   :  { %s1355_s18 = scalar_lea.vmem %s16_s10, 256  ;;  %p1360_p4 = scmp.lt.s32.totalorder %s16_s10, %s16_s10 }
   0xa   :  { %p1356_p3 = scmp.ne.s32.totalorder %s16_s10, %s1355_s18  ;;  %p1361_p5 = scmp.lt.s32.totalorder %s1355_s18, %s1355_s18 }
   0xc   :  { %p1362_p6 = por %p1361_p5, %p1360_p4 }
   0xe   :  { %p1363_p7 = pnand %p1362_p6, %p1356_p3 }
  0x10   :  { %1366 = shalt.err (!%p1363_p7)
}
  0x11   :  { %s1418_s19 = smov 128   ;;  %s1419_s20 = smov 8  }
  0x12   :  { %21 = dma.hbm_to_vmem [thread:$0]  %s2365_s0, 256, %s16_s10, [#allocation3], %s1418_s19, %s1418_s19, %s1419_s20  }
  0x13   :  { %s1420_s23 = smov [#allocation5]   ;;  %s1367_s27 = scalar_lea.hbm %s2366_s1, 1024 }
  0x14   :  { %s27_s24 = sshll.u32 %s1420_s23, 4  ;;  %p1368_p8 = scmp.ne.s32.totalorder %s2366_s1, %s1367_s27  ;;  %s28_s24 = int_to_ptr.vmem [resolvable:$true] %s27_s24 }
  0x15   :  { %p1371_p9 = scmp.lt.u32.totalorder %s1367_s27, %s2366_s1 }
  0x17   :  { %p1373_p10 = pnand %p1371_p9, %p1368_p8 }
  0x19   :  { %1376 = shalt.err (!%p1373_p10)
}
  0x1a   :  { %s1377_s4 = scalar_lea.vmem %s28_s24, 1024  ;;  %p1382_p12 = scmp.lt.s32.totalorder %s28_s24, %s28_s24 }
  0x1b   :  { %p1378_p11 = scmp.ne.s32.totalorder %s28_s24, %s1377_s4  ;;  %p1383_p13 = scmp.lt.s32.totalorder %s1377_s4, %s1377_s4 }
  0x1d   :  { %p1384_p0 = por %p1383_p13, %p1382_p12 }
  0x1f   :  { %p1385_p1 = pnand %p1384_p0, %p1378_p11 }
  0x21   :  { %1388 = shalt.err (!%p1385_p1)
}
  0x22   :  { %s1421_s0 = smov 512   ;;  %s1422_s5 = smov 32  }
  0x23   :  { %33 = dma.hbm_to_vmem [thread:$0]  %s2366_s1, 1024, %s28_s24, [#allocation6], %s1421_s0, %s1421_s0, %s1422_s5  }
  0x24   :  { %1411 = dma.done.wait [#allocation3], 256  }
  0x25   :  { %1412 = vsyncadd [#allocation3], 4294967040 }
  0x26   :  { %1413 = dma.done.wait [#allocation6], 1024  }
  0x27   :  { %1414 = vsyncadd [#allocation6], 4294966272  ;;  %v1423_v0 = vmov 2   ;;  %v1424_v1 = vmov 0   ;;  %v1482_v2 = vld [vmem:[#allocation2] sm:$0xff]  ;;  %v1425_v3 = vmov 3   ;;  %v48_v18 = vlaneseq }
  0x28   :  { %1317 = vset.pattern.permute.xlu1 %v1423_v0  ;;  %1316 = vset.pattern.permute.xlu0 %v1424_v1  ;;  %v1426_v4 = vmov 5   ;;  %v1427_v5 = vmov 4   ;;  %v1428_v6 = vmov 1   ;;  %v665_v7 = vld [vmem:[#allocation2 + $0x8] sm:$0xff]  ;;  %v1429_v8 = vmov 6   ;;  %s1439_s1 = smov [#allocation7]  }
  0x29   :  { %114 = vperm.xlu1 %1317, %v1482_v2   ;;  %44 = vperm.xlu0 %1316, %v1482_v2   ;;  %v1430_v9 = vmov 7   ;;  %v1431_v10 = vmov 8   ;;  %v1432_v11 = vmov 10   ;;  %v1433_v12 = vmov 11   ;;  %s1280_s8 = sshll.u32 %s1439_s1, 4  ;;  %s1281_s8 = int_to_ptr.vmem [resolvable:$true] %s1280_s8 }
  0x2a   :  { %v1434_v13 = vmov 13   ;;  %v1435_v14 = vmov 14   ;;  %v1436_v15 = vmov 15   ;;  %v1437_v16 = vmov 9   ;;  %s1389_s9 = scalar_lea.vmem %s1281_s8, 1024  ;;  %p1394_p3 = scmp.lt.s32.totalorder %s1281_s8, %s1281_s8 }
  0x2b   :  { %v1438_v17 = vmov 12   ;;  %v49_v19 = vshrl.u32 %v48_v18, 7  ;;  %v1508_v24 = vld [vmem:[#allocation5 + $0x2] ss:$8 sm:$0xf]  ;;  %p1390_p2 = scmp.ne.s32.totalorder %s1281_s8, %s1389_s9  ;;  %p1395_p4 = scmp.lt.s32.totalorder %s1389_s9, %s1389_s9 }
  0x2c   :  { %v1510_v25 = vld [vmem:[#allocation5] ss:$8 sm:$0xf]  ;;  %v1512_v26 = vld [vmem:[#allocation5 + $0x3] ss:$8 sm:$0xf] }
  0x2d   :  { %1318 = vset.pattern.permute.xlu1 %v1425_v3  ;;  %1320 = vset.pattern.permute.xlu0 %v1426_v4  ;;  %v1500_v20 = vsub.s32 0, %v49_v19  ;;  %v1502_v21 = vsub.s32 1, %v49_v19  ;;  %v1504_v22 = vsub.s32 2, %v49_v19  ;;  %v1506_v23 = vsub.s32 3, %v49_v19  ;;  %p1396_p5 = por %p1395_p4, %p1394_p3 }
  0x2e   :  { %153 = vperm.xlu1 %1318, %v1482_v2   ;;  %231 = vperm.xlu0 %1320, %v1482_v2   ;;  %v1522_v31 = vld [vmem:[#allocation5 + $0x5] ss:$8 sm:$0xf]  ;;  %v1532_v36 = vld [vmem:[#allocation5 + $0x4] ss:$8 sm:$0xf] }
  0x2f   :  { %v121_v27 = vrot.slane %v1508_v24, %v1500_v20  ;;  %v125_v28 = vrot.slane %v1508_v24, %v1502_v21  ;;  %v129_v29 = vrot.slane %v1508_v24, %v1504_v22  ;;  %v133_v30 = vrot.slane %v1508_v24, %v1506_v23  ;;  %v1542_v41 = vld [vmem:[#allocation5 + $0x1] ss:$8 sm:$0xf]  ;;  %v1552_v46 = vld [vmem:[#allocation5 + $0x6] ss:$8 sm:$0xf]  ;;  %p1397_p6 = pnand %p1396_p5, %p1390_p2 }
  0x30   :  { %v51_v32 = vrot.slane %v1510_v25, %v1500_v20  ;;  %v55_v33 = vrot.slane %v1510_v25, %v1502_v21  ;;  %v59_v34 = vrot.slane %v1510_v25, %v1504_v22  ;;  %v63_v35 = vrot.slane %v1510_v25, %v1506_v23  ;;  %v1562_v51 = vld [vmem:[#allocation5 + $0x1] ss:$8 sm:$0xf]  ;;  %v1572_v56 = vld [vmem:[#allocation5] ss:$8 sm:$0xf] }
  0x31   :  { %v160_v37 = vrot.slane %v1512_v26, %v1500_v20  ;;  %v164_v38 = vrot.slane %v1512_v26, %v1502_v21  ;;  %v168_v39 = vrot.slane %v1512_v26, %v1504_v22  ;;  %v172_v40 = vrot.slane %v1512_v26, %v1506_v23  ;;  %v1582_v61 = vld [vmem:[#allocation5 + $0x7] ss:$8 sm:$0xf]  ;;  %v1742_v59 = vld [vmem:[#allocation5 + $0x25] ss:$8 sm:$0xf] }
  0x32   :  { %1319 = vset.pattern.permute.xlu1 %v1427_v5  ;;  %1321 = vset.pattern.permute.xlu0 %v1428_v6  ;;  %v199_v47 = vrot.slane %v1532_v36, %v1500_v20  ;;  %v203_v48 = vrot.slane %v1532_v36, %v1502_v21  ;;  %v207_v49 = vrot.slane %v1532_v36, %v1504_v22  ;;  %v1672_v6 = vld [vmem:[#allocation5 + $0x21] ss:$8 sm:$0xf]  ;;  %v1752_v58 = vld [vmem:[#allocation5 + $0x24] ss:$8 sm:$0xf] }
  0x33   :  { %192 = vperm.xlu1 %1319, %v1482_v2   ;;  %75 = vperm.xlu0 %1321, %v1482_v2   ;;  %v82_v52 = vrot.slane %v1542_v41, %v1500_v20  ;;  %v86_v53 = vrot.slane %v1542_v41, %v1502_v21  ;;  %v90_v54 = vrot.slane %v1542_v41, %v1504_v22  ;;  %v1762_v57 = vld [vmem:[#allocation5 + $0x25] ss:$8 sm:$0xf]  ;;  %v1772_v45 = vld [vmem:[#allocation5 + $0x26] ss:$8 sm:$0xf] }
  0x34   :  { %v94_v55 = vrot.slane %v1542_v41, %v1506_v23  ;;  %2393 = vst [vmem:[#allocation16_spill] sm:$0xff] %v1742_v59  ;;  %2394 = vst [vmem:[#allocation17_spill] sm:$0xff] %v1752_v58  ;;  %v1784_v43 = vld [vmem:[#allocation5 + $0x26] ss:$8 sm:$0xf] }
  0x35   :  { %2395 = vst [vmem:[#allocation18_spill] sm:$0xff] %v1762_v57  ;;  %2396 = vst [vmem:[#allocation19_spill] sm:$0xff] %v1772_v45 }
  0x36   :  { %2397 = vst [vmem:[#allocation20_spill] sm:$0xff] %v1784_v43 }
  0x37   :  { %1322 = vset.pattern.permute.xlu1 %v1429_v8  ;;  %699 = vperm.xlu0 %1321, %v665_v7  }
  0x38   :  { %270 = vperm.xlu1 %1322, %v1482_v2  }
  0x3b   :  { %1326 = vset.pattern.permute.xlu0 %v1427_v5  ;;  %v1682_v5 = vld [vmem:[#allocation5 + $0x22] ss:$8 sm:$0xf] }
  0x3c   :  { %1323 = vset.pattern.permute.xlu1 %v1424_v1  ;;  %813 = vperm.xlu0 %1326, %v665_v7   ;;  %v1712_v1 = vld [vmem:[#allocation5 + $0x23] ss:$8 sm:$0xf] }
  0x3d   :  { %669 = vperm.xlu1 %1323, %v665_v7   ;;  %2390 = vst [vmem:[#allocation13_spill] sm:$0xff] %v1712_v1 }
  0x40   :  { %1329 = vset.pattern.permute.xlu0 %v1430_v9 }
  0x41   :  { %1324 = vset.pattern.permute.xlu1 %v1423_v0  ;;  %309 = vperm.xlu0 %1329, %v1482_v2   ;;  %v1722_v0 = vld [vmem:[#allocation5 + $0x23] ss:$8 sm:$0xf] }
  0x42   :  { %737 = vperm.xlu1 %1324, %v665_v7   ;;  %2391 = vst [vmem:[#allocation14_spill] sm:$0xff] %v1722_v0 }
  0x45   :  { %1332 = vset.pattern.permute.xlu0 %v1431_v10 }
  0x46   :  { %1325 = vset.pattern.permute.xlu1 %v1425_v3  ;;  %965 = vperm.xlu0 %1332, %v665_v7   ;;  %v1702_v3 = vld [vmem:[#allocation5 + $0x22] ss:$8 sm:$0xf] }
  0x47   :  { %775 = vperm.xlu1 %1325, %v665_v7   ;;  %2389 = vst [vmem:[#allocation12_spill] sm:$0xff] %v1702_v3 }
  0x4a   :  { %1334 = vset.pattern.permute.xlu0 %v1432_v11 }
  0x4b   :  { %1327 = vset.pattern.permute.xlu1 %v1426_v4  ;;  %426 = vperm.xlu0 %1334, %v1482_v2   ;;  %v1692_v4 = vld [vmem:[#allocation5 + $0x21] ss:$8 sm:$0xf] }
  0x4c   :  { %851 = vperm.xlu1 %1327, %v665_v7   ;;  %2388 = vst [vmem:[#allocation11_spill] sm:$0xff] %v1692_v4 }
  0x4f   :  { %1337 = vset.pattern.permute.xlu0 %v1433_v12 }
  0x50   :  { %1328 = vset.pattern.permute.xlu1 %v1429_v8  ;;  %1079 = vperm.xlu0 %1337, %v665_v7  }
  0x51   :  { %889 = vperm.xlu1 %1328, %v665_v7  }
  0x54   :  { %1339 = vset.pattern.permute.xlu0 %v1434_v13 }
  0x55   :  { %1330 = vset.pattern.permute.xlu1 %v1430_v9  ;;  %543 = vperm.xlu0 %1339, %v1482_v2   ;;  %v1632_v9 = vld [vmem:[#allocation5 + $0x6] ss:$8 sm:$0xf] }
  0x56   :  { %927 = vperm.xlu1 %1330, %v665_v7  }
  0x59   :  { %1342 = vset.pattern.permute.xlu0 %v1435_v14 }
  0x5a   :  { %1331 = vset.pattern.permute.xlu1 %v1431_v10  ;;  %1193 = vperm.xlu0 %1342, %v665_v7  }
  0x5b   :  { %348 = vperm.xlu1 %1331, %v1482_v2  }
  0x5e   :  { %1344 = vset.pattern.permute.xlu0 %v1436_v15 }
  0x5f   :  { %1333 = vset.pattern.permute.xlu1 %v1437_v16 }
  0x60   :  { %387 = vperm.xlu1 %1333, %v1482_v2  }
  0x64   :  { %1003 = vperm.xlu1 %1333, %v665_v7  }
  0x68   :  { %1335 = vset.pattern.permute.xlu1 %v1432_v11  ;;  %v1732_v11 = vld [vmem:[#allocation5 + $0x24] ss:$8 sm:$0xf] }
  0x69   :  { %1041 = vperm.xlu1 %1335, %v665_v7   ;;  %2392 = vst [vmem:[#allocation15_spill] sm:$0xff] %v1732_v11 }
  0x6d   :  { %1336 = vset.pattern.permute.xlu1 %v1433_v12  ;;  %v1612_v12 = vld [vmem:[#allocation5 + $0x3] ss:$8 sm:$0xf] }
  0x6e   :  { %465 = vperm.xlu1 %1336, %v1482_v2  }
  0x72   :  { %1338 = vset.pattern.permute.xlu1 %v1438_v17  ;;  %v1622_v17 = vld [vmem:[#allocation5 + $0x5] ss:$8 sm:$0xf] }
  0x73   :  { %504 = vperm.xlu1 %1338, %v1482_v2  }
  0x77   :  { %1117 = vperm.xlu1 %1338, %v665_v7  }
  0x7b   :  { %1340 = vset.pattern.permute.xlu1 %v1434_v13  ;;  %v1662_v13 = vld [vmem:[#allocation5 + $0x20] ss:$8 sm:$0xf] }
  0x7c   :  { %1155 = vperm.xlu1 %1340, %v665_v7  }
  0x80   :  { %1341 = vset.pattern.permute.xlu1 %v1435_v14  ;;  %v1652_v14 = vld [vmem:[#allocation5 + $0x20] ss:$8 sm:$0xf] }
  0x81   :  { %582 = vperm.xlu1 %1341, %v1482_v2  }
  0x85   :  { %1343 = vset.pattern.permute.xlu1 %v1436_v15  ;;  %v1642_v15 = vld [vmem:[#allocation5 + $0x7] ss:$8 sm:$0xf] }
  0x86   :  { %621 = vperm.xlu1 %1343, %v1482_v2   ;;  %v1592_v2 = vld [vmem:[#allocation5 + $0x4] ss:$8 sm:$0xf] }
  0x8a   :  { %1231 = vperm.xlu1 %1343, %v665_v7   ;;  %v1602_v7 = vld [vmem:[#allocation5 + $0x2] ss:$8 sm:$0xf] }
  0xa8   :  { %v115_v8 = vpop.permute.xlu1 %114  ;;  %v45_v63 = vpop.permute.xlu0 %44 }
  0xa9   :  { %v138_v16 = vsub.f32 %v115_v8, %v121_v27  ;;  %v139_v62 = vsub.f32 %v115_v8, %v125_v28  ;;  %v140_v42 = vsub.f32 %v115_v8, %v129_v29  ;;  %v141_v19 = vsub.f32 %v115_v8, %v133_v30 }
  0xaa   :  { %v68_v60 = vsub.f32 %v45_v63, %v51_v32  ;;  %v69_v27 = vsub.f32 %v45_v63, %v55_v33  ;;  %v70_v28 = vsub.f32 %v45_v63, %v59_v34  ;;  %v71_v29 = vsub.f32 %v45_v63, %v63_v35 }
  0xad   :  { %v154_v18 = vpop.permute.xlu1 %153  ;;  %v1774_v44 = vpop.permute.xlu0 %231 }
  0xae   :  { %v177_v24 = vsub.f32 %v154_v18, %v160_v37  ;;  %v178_v30 = vsub.f32 %v154_v18, %v164_v38  ;;  %v179_v32 = vsub.f32 %v154_v18, %v168_v39  ;;  %v180_v33 = vsub.f32 %v154_v18, %v172_v40 }
  0xaf   :  { %v2398_v40 = vrot.slane %v1532_v36, %v1506_v23 }
  0xb2   :  { %v193_v10 = vpop.permute.xlu1 %192  ;;  %v76_v50 = vpop.permute.xlu0 %75 }
  0xb3   :  { %v99_v25 = vsub.f32 %v76_v50, %v82_v52  ;;  %v100_v34 = vsub.f32 %v76_v50, %v86_v53  ;;  %v101_v35 = vsub.f32 %v76_v50, %v90_v54  ;;  %v102_v37 = vsub.f32 %v76_v50, %v94_v55 }
  0xb4   :  { %v216_v26 = vsub.f32 %v193_v10, %v199_v47  ;;  %v217_v38 = vsub.f32 %v193_v10, %v203_v48  ;;  %v218_v39 = vsub.f32 %v193_v10, %v207_v49  ;;  %v219_v52 = vsub.f32 %v193_v10, %v2398_v40 }
  0xb5   :  { %v103_v53 = vmax.f32 %v68_v60, %v99_v25  ;;  %v104_v54 = vmax.f32 %v69_v27, %v100_v34  ;;  %v105_v41 = vmax.f32 %v70_v28, %v101_v35  ;;  %v106_v50 = vmax.f32 %v71_v29, %v102_v37 }
  0xb6   :  { %v107_v55 = vmin.f32 %v68_v60, %v99_v25  ;;  %v108_v63 = vmin.f32 %v69_v27, %v100_v34  ;;  %v109_v8 = vmin.f32 %v70_v28, %v101_v35  ;;  %v110_v47 = vmin.f32 %v71_v29, %v102_v37 }
  0xb7   :  { %v271_v18 = vpop.permute.xlu1 %270  ;;  %v142_v43 = vmax.f32 %v103_v53, %v138_v16  ;;  %v143_v57 = vmax.f32 %v104_v54, %v139_v62  ;;  %v144_v48 = vmax.f32 %v105_v41, %v140_v42  ;;  %v145_v45 = vmax.f32 %v106_v50, %v141_v19 }
  0xb8   :  { %v146_v58 = vmin.f32 %v107_v55, %v138_v16  ;;  %v147_v59 = vmin.f32 %v108_v63, %v139_v62  ;;  %v148_v49 = vmin.f32 %v109_v8, %v140_v42  ;;  %v149_v11 = vmin.f32 %v110_v47, %v141_v19 }
  0xb9   :  { %v181_v0 = vmax.f32 %v142_v43, %v177_v24  ;;  %v182_v36 = vmax.f32 %v143_v57, %v178_v30  ;;  %v183_v10 = vmax.f32 %v144_v48, %v179_v32  ;;  %v184_v40 = vmax.f32 %v145_v45, %v180_v33 }
  0xba   :  { %v185_v1 = vmin.f32 %v146_v58, %v177_v24  ;;  %v186_v3 = vmin.f32 %v147_v59, %v178_v30  ;;  %v187_v4 = vmin.f32 %v148_v49, %v179_v32  ;;  %v188_v60 = vmin.f32 %v149_v11, %v180_v33  ;;  %v1886_v59 = vld [vmem:[#allocation5 + $0x27] ss:$8 sm:$0xf]  ;;  %v700_v30 = vpop.permute.xlu0 %699 }
  0xbb   :  { %v2399_v27 = vrot.slane %v1522_v31, %v1500_v20  ;;  %v2400_v29 = vrot.slane %v1522_v31, %v1502_v21  ;;  %v2401_v42 = vrot.slane %v1522_v31, %v1504_v22  ;;  %v2402_v45 = vrot.slane %v1522_v31, %v1506_v23  ;;  %v1888_v32 = vld [vmem:[#allocation5 + $0x27] ss:$8 sm:$0xf] }
  0xbc   :  { %v670_v58 = vpop.permute.xlu1 %669  ;;  %v220_v11 = vmax.f32 %v181_v0, %v216_v26  ;;  %v221_v16 = vmax.f32 %v182_v36, %v217_v38  ;;  %v222_v19 = vmax.f32 %v183_v10, %v218_v39  ;;  %v223_v24 = vmax.f32 %v184_v40, %v219_v52 }
  0xbd   :  { %v255_v28 = vsub.f32 %v1774_v44, %v2399_v27  ;;  %v256_v62 = vsub.f32 %v1774_v44, %v2400_v29  ;;  %v257_v43 = vsub.f32 %v1774_v44, %v2401_v42  ;;  %v258_v57 = vsub.f32 %v1774_v44, %v2402_v45 }
  0xbe   :  { %v224_v33 = vmin.f32 %v185_v1, %v216_v26  ;;  %v225_v25 = vmin.f32 %v186_v3, %v217_v38  ;;  %v226_v34 = vmin.f32 %v187_v4, %v218_v39  ;;  %v227_v35 = vmin.f32 %v188_v60, %v219_v52  ;;  %v814_v27 = vpop.permute.xlu0 %813 }
  0xbf   :  { %v259_v26 = vmax.f32 %v220_v11, %v255_v28  ;;  %v260_v38 = vmax.f32 %v221_v16, %v256_v62  ;;  %v261_v39 = vmax.f32 %v222_v19, %v257_v43  ;;  %v262_v52 = vmax.f32 %v223_v24, %v258_v57 }
  0xc0   :  { %v263_v41 = vmin.f32 %v224_v33, %v255_v28  ;;  %v264_v50 = vmin.f32 %v225_v25, %v256_v62  ;;  %v265_v55 = vmin.f32 %v226_v34, %v257_v43  ;;  %v266_v63 = vmin.f32 %v227_v35, %v258_v57 }
  0xc1   :  { %v738_v54 = vpop.permute.xlu1 %737  ;;  %v2403_v8 = vrot.slane %v1552_v46, %v1500_v20  ;;  %v2404_v48 = vrot.slane %v1552_v46, %v1502_v21  ;;  %v2405_v36 = vrot.slane %v1552_v46, %v1504_v22  ;;  %v2406_v40 = vrot.slane %v1552_v46, %v1506_v23 }
  0xc2   :  { %v2407_v28 = vrot.slane %v1562_v51, %v1500_v20  ;;  %v2408_v62 = vrot.slane %v1562_v51, %v1502_v21  ;;  %v2409_v43 = vrot.slane %v1562_v51, %v1504_v22  ;;  %v2410_v57 = vrot.slane %v1562_v51, %v1506_v23 }
  0xc3   :  { %v294_v47 = vsub.f32 %v271_v18, %v2403_v8  ;;  %v295_v49 = vsub.f32 %v271_v18, %v2404_v48  ;;  %v296_v10 = vsub.f32 %v271_v18, %v2405_v36  ;;  %v297_v60 = vsub.f32 %v271_v18, %v2406_v40 }
  0xc4   :  { %v723_v29 = vsub.f32 %v700_v30, %v2407_v28  ;;  %v724_v42 = vsub.f32 %v700_v30, %v2408_v62  ;;  %v725_v45 = vsub.f32 %v700_v30, %v2409_v43  ;;  %v726_v11 = vsub.f32 %v700_v30, %v2410_v57 }
  0xc5   :  { %v1930_v16 = vmax.f32 %v259_v26, %v294_v47  ;;  %v1932_v46 = vmax.f32 %v260_v38, %v295_v49  ;;  %v1934_v18 = vmax.f32 %v261_v39, %v296_v10  ;;  %v1936_v19 = vmax.f32 %v262_v52, %v297_v60 }
  0xc6   :  { %v2411_v24 = vrot.slane %v1572_v56, %v1500_v20  ;;  %v2412_v25 = vrot.slane %v1572_v56, %v1502_v21  ;;  %v2413_v51 = vrot.slane %v1572_v56, %v1504_v22  ;;  %v2414_v35 = vrot.slane %v1572_v56, %v1506_v23  ;;  %v776_v38 = vpop.permute.xlu1 %775 }
  0xc7   :  { %v1950_v39 = vmin.f32 %v263_v41, %v294_v47  ;;  %v1952_v52 = vmin.f32 %v264_v50, %v295_v49  ;;  %v1954_v8 = vmin.f32 %v265_v55, %v296_v10  ;;  %v1956_v48 = vmin.f32 %v266_v63, %v297_v60  ;;  %v310_v55 = vpop.permute.xlu0 %309 }
  0xc8   :  { %v693_v33 = vsub.f32 %v670_v58, %v2411_v24  ;;  %v694_v34 = vsub.f32 %v670_v58, %v2412_v25  ;;  %v695_v30 = vsub.f32 %v670_v58, %v2413_v51  ;;  %v696_v26 = vsub.f32 %v670_v58, %v2414_v35 }
  0xc9   :  { %v2415_v36 = vrot.slane %v1592_v2, %v1500_v20  ;;  %v2416_v28 = vrot.slane %v1592_v2, %v1502_v21  ;;  %v2417_v56 = vrot.slane %v1592_v2, %v1504_v22  ;;  %v2418_v41 = vrot.slane %v1592_v2, %v1506_v23 }
  0xca   :  { %v2419_v63 = vrot.slane %v1602_v7, %v1500_v20  ;;  %v2420_v49 = vrot.slane %v1602_v7, %v1502_v21  ;;  %v2421_v60 = vrot.slane %v1602_v7, %v1504_v22  ;;  %v2422_v57 = vrot.slane %v1602_v7, %v1506_v23 }
  0xcb   :  { %v837_v40 = vsub.f32 %v814_v27, %v2415_v36  ;;  %v838_v62 = vsub.f32 %v814_v27, %v2416_v28  ;;  %v839_v58 = vsub.f32 %v814_v27, %v2417_v56  ;;  %v840_v50 = vsub.f32 %v814_v27, %v2418_v41  ;;  %v852_v41 = vpop.permute.xlu1 %851 }
  0xcc   :  { %v761_v47 = vsub.f32 %v738_v54, %v2419_v63  ;;  %v762_v10 = vsub.f32 %v738_v54, %v2420_v49  ;;  %v763_v43 = vsub.f32 %v738_v54, %v2421_v60  ;;  %v764_v24 = vsub.f32 %v738_v54, %v2422_v57 }
  0xcd   :  { %v727_v25 = vmax.f32 %v693_v33, %v723_v29  ;;  %v728_v2 = vmax.f32 %v694_v34, %v724_v42  ;;  %v729_v27 = vmax.f32 %v695_v30, %v725_v45  ;;  %v730_v51 = vmax.f32 %v696_v26, %v726_v11 }
  0xce   :  { %v731_v35 = vmin.f32 %v693_v33, %v723_v29  ;;  %v732_v36 = vmin.f32 %v694_v34, %v724_v42  ;;  %v733_v28 = vmin.f32 %v695_v30, %v725_v45  ;;  %v734_v56 = vmin.f32 %v696_v26, %v726_v11 }
  0xcf   :  { %v2423_v63 = vrot.slane %v1582_v61, %v1500_v20  ;;  %v2424_v60 = vrot.slane %v1582_v61, %v1502_v21  ;;  %v2425_v7 = vrot.slane %v1582_v61, %v1504_v22  ;;  %v2426_v29 = vrot.slane %v1582_v61, %v1506_v23 }
  0xd0   :  { %v765_v45 = vmax.f32 %v727_v25, %v761_v47  ;;  %v766_v11 = vmax.f32 %v728_v2, %v762_v10  ;;  %v767_v33 = vmax.f32 %v729_v27, %v763_v43  ;;  %v768_v34 = vmax.f32 %v730_v51, %v764_v24  ;;  %v890_v53 = vpop.permute.xlu1 %889 }
  0xd1   :  { %v1985_v49 = vsub.f32 %v310_v55, %v2423_v63  ;;  %v1990_v4 = vsub.f32 %v310_v55, %v2424_v60  ;;  %v1995_v54 = vsub.f32 %v310_v55, %v2425_v7  ;;  %v2000_v42 = vsub.f32 %v310_v55, %v2426_v29 }
  0xd2   :  { %v2427_v30 = vrot.slane %v1612_v12, %v1500_v20  ;;  %v2428_v57 = vrot.slane %v1612_v12, %v1502_v21  ;;  %v2429_v60 = vrot.slane %v1612_v12, %v1504_v22  ;;  %v2430_v61 = vrot.slane %v1612_v12, %v1506_v23 }
  0xd3   :  { %v769_v25 = vmin.f32 %v731_v35, %v761_v47  ;;  %v770_v2 = vmin.f32 %v732_v36, %v762_v10  ;;  %v771_v27 = vmin.f32 %v733_v28, %v763_v43  ;;  %v772_v51 = vmin.f32 %v734_v56, %v764_v24 }
  0xd4   :  { %v799_v26 = vsub.f32 %v776_v38, %v2427_v30  ;;  %v800_v63 = vsub.f32 %v776_v38, %v2428_v57  ;;  %v801_v7 = vsub.f32 %v776_v38, %v2429_v60  ;;  %v802_v55 = vsub.f32 %v776_v38, %v2430_v61 }
  0xd5   :  { %v2431_v60 = vrot.slane %v1622_v17, %v1500_v20  ;;  %v2432_v12 = vrot.slane %v1622_v17, %v1502_v21  ;;  %v2433_v47 = vrot.slane %v1622_v17, %v1504_v22  ;;  %v2434_v43 = vrot.slane %v1622_v17, %v1506_v23 }
  0xd6   :  { %v803_v29 = vmax.f32 %v765_v45, %v799_v26  ;;  %v804_v3 = vmax.f32 %v766_v11, %v800_v63  ;;  %v805_v1 = vmax.f32 %v767_v33, %v801_v7  ;;  %v806_v30 = vmax.f32 %v768_v34, %v802_v55 }
  0xd7   :  { %v807_v0 = vmin.f32 %v769_v25, %v799_v26  ;;  %v808_v44 = vmin.f32 %v770_v2, %v800_v63  ;;  %v809_v57 = vmin.f32 %v771_v27, %v801_v7  ;;  %v810_v31 = vmin.f32 %v772_v51, %v802_v55  ;;  %v928_v7 = vpop.permute.xlu1 %927 }
  0xd8   :  { %v875_v37 = vsub.f32 %v852_v41, %v2431_v60  ;;  %v876_v38 = vsub.f32 %v852_v41, %v2432_v12  ;;  %v877_v10 = vsub.f32 %v852_v41, %v2433_v47  ;;  %v878_v24 = vsub.f32 %v852_v41, %v2434_v43 }
  0xd9   :  { %v841_v35 = vmax.f32 %v803_v29, %v837_v40  ;;  %v842_v36 = vmax.f32 %v804_v3, %v838_v62  ;;  %v843_v28 = vmax.f32 %v805_v1, %v839_v58  ;;  %v844_v56 = vmax.f32 %v806_v30, %v840_v50 }
  0xda   :  { %v337_v45 = vmax.f32 %v1930_v16, %v1985_v49  ;;  %v845_v26 = vmin.f32 %v807_v0, %v837_v40  ;;  %v846_v63 = vmin.f32 %v808_v44, %v838_v62  ;;  %v847_v17 = vmin.f32 %v809_v57, %v839_v58 }
  0xdb   :  { %v848_v41 = vmin.f32 %v810_v31, %v840_v50  ;;  %v2435_v1 = vrot.slane %v1632_v9, %v1500_v20  ;;  %v2436_v61 = vrot.slane %v1632_v9, %v1502_v21  ;;  %v2437_v25 = vrot.slane %v1632_v9, %v1504_v22 }
  0xdc   :  { %v2438_v27 = vrot.slane %v1632_v9, %v1506_v23  ;;  %v879_v44 = vmax.f32 %v841_v35, %v875_v37  ;;  %v880_v40 = vmax.f32 %v842_v36, %v876_v38  ;;  %v881_v31 = vmax.f32 %v843_v28, %v877_v10 }
  0xdd   :  { %v913_v3 = vsub.f32 %v890_v53, %v2435_v1  ;;  %v914_v55 = vsub.f32 %v890_v53, %v2436_v61  ;;  %v915_v2 = vsub.f32 %v890_v53, %v2437_v25  ;;  %v882_v62 = vmax.f32 %v844_v56, %v878_v24  ;;  %v966_v1 = vpop.permute.xlu0 %965  ;;  %v349_v61 = vpop.permute.xlu1 %348 }
  0xde   :  { %v916_v0 = vsub.f32 %v890_v53, %v2438_v27  ;;  %v2439_v58 = vrot.slane %v1642_v15, %v1500_v20  ;;  %v2440_v51 = vrot.slane %v1642_v15, %v1502_v21  ;;  %v2441_v30 = vrot.slane %v1642_v15, %v1504_v22 }
  0xdf   :  { %v2442_v9 = vrot.slane %v1642_v15, %v1506_v23  ;;  %v883_v60 = vmin.f32 %v845_v26, %v875_v37  ;;  %v884_v12 = vmin.f32 %v846_v63, %v876_v38  ;;  %v885_v47 = vmin.f32 %v847_v17, %v877_v10 }
  0xe0   :  { %v951_v50 = vsub.f32 %v928_v7, %v2439_v58  ;;  %v952_v29 = vsub.f32 %v928_v7, %v2440_v51  ;;  %v953_v57 = vsub.f32 %v928_v7, %v2441_v30  ;;  %v886_v43 = vmin.f32 %v848_v41, %v878_v24 }
  0xe1   :  { %v954_v53 = vsub.f32 %v928_v7, %v2442_v9  ;;  %v917_v35 = vmax.f32 %v879_v44, %v913_v3  ;;  %v918_v36 = vmax.f32 %v880_v40, %v914_v55  ;;  %v919_v28 = vmax.f32 %v881_v31, %v915_v2  ;;  %v388_v31 = vpop.permute.xlu1 %387 }
  0xe2   :  { %v920_v56 = vmax.f32 %v882_v62, %v916_v0  ;;  %v921_v25 = vmin.f32 %v883_v60, %v913_v3  ;;  %v922_v27 = vmin.f32 %v884_v12, %v914_v55  ;;  %v923_v58 = vmin.f32 %v885_v47, %v915_v2 }
  0xe3   :  { %v924_v51 = vmin.f32 %v886_v43, %v916_v0  ;;  %v955_v34 = vmax.f32 %v917_v35, %v951_v50  ;;  %v956_v30 = vmax.f32 %v918_v36, %v952_v29  ;;  %v957_v33 = vmax.f32 %v919_v28, %v953_v57 }
  0xe4   :  { %v958_v11 = vmax.f32 %v920_v56, %v954_v53  ;;  %v2443_v15 = vrot.slane %v1652_v14, %v1500_v20  ;;  %v2444_v38 = vrot.slane %v1652_v14, %v1502_v21  ;;  %v2445_v24 = vrot.slane %v1652_v14, %v1504_v22 }
  0xe5   :  { %v2446_v63 = vrot.slane %v1652_v14, %v1506_v23  ;;  %v959_v41 = vmin.f32 %v921_v25, %v951_v50  ;;  %v960_v7 = vmin.f32 %v922_v27, %v952_v29  ;;  %v961_v3 = vmin.f32 %v923_v58, %v953_v57  ;;  %v1004_v25 = vpop.permute.xlu1 %1003 }
  0xe6   :  { %v989_v37 = vsub.f32 %v966_v1, %v2443_v15  ;;  %v990_v10 = vsub.f32 %v966_v1, %v2444_v38  ;;  %v991_v26 = vsub.f32 %v966_v1, %v2445_v24  ;;  %v962_v55 = vmin.f32 %v924_v51, %v954_v53 }
  0xe7   :  { %v992_v17 = vsub.f32 %v966_v1, %v2446_v63  ;;  %v341_v2 = vmin.f32 %v1950_v39, %v1985_v49  ;;  %v342_v0 = vmin.f32 %v1952_v52, %v1990_v4  ;;  %v343_v44 = vmin.f32 %v1954_v8, %v1995_v54 }
  0xe8   :  { %v344_v40 = vmin.f32 %v1956_v48, %v2000_v42  ;;  %v2447_v14 = vrot.slane %v1662_v13, %v1500_v20  ;;  %v2448_v50 = vrot.slane %v1662_v13, %v1502_v21  ;;  %v2449_v39 = vrot.slane %v1662_v13, %v1504_v22 }
  0xe9   :  { %v2450_v52 = vrot.slane %v1662_v13, %v1506_v23  ;;  %v993_v9 = vmax.f32 %v955_v34, %v989_v37  ;;  %v994_v53 = vmax.f32 %v956_v30, %v990_v10  ;;  %v995_v48 = vmax.f32 %v957_v33, %v991_v26 }
  0xea   :  { %v372_v62 = vsub.f32 %v349_v61, %v2447_v14  ;;  %v373_v29 = vsub.f32 %v349_v61, %v2448_v50  ;;  %v374_v57 = vsub.f32 %v349_v61, %v2449_v39  ;;  %v996_v60 = vmax.f32 %v958_v11, %v992_v17  ;;  %v1042_v14 = vpop.permute.xlu1 %1041 }
  0xeb   :  { %v375_v8 = vsub.f32 %v349_v61, %v2450_v52  ;;  %v2090_v12 = vmin.f32 %v959_v41, %v989_v37  ;;  %v2092_v47 = vmin.f32 %v960_v7, %v990_v10  ;;  %v2094_v43 = vmin.f32 %v961_v3, %v991_v26  ;;  %v427_v61 = vpop.permute.xlu0 %426  ;;  %v2462_v7 = vld [vmem:[#allocation11_spill] sm:$0xff] }
  0xec   :  { %v2096_v35 = vmin.f32 %v962_v55, %v992_v17  ;;  %v2451_v36 = vrot.slane %v1672_v6, %v1500_v20  ;;  %v2452_v13 = vrot.slane %v1672_v6, %v1502_v21  ;;  %v2453_v33 = vrot.slane %v1672_v6, %v1504_v22 }
  0xed   :  { %v2454_v34 = vrot.slane %v1672_v6, %v1506_v23  ;;  %v376_v27 = vmax.f32 %v337_v45, %v372_v62  ;;  %v2455_v58 = vmax.f32 %v1932_v46, %v1990_v4  ;;  %v2456_v30 = vmax.f32 %v1934_v18, %v1995_v54 }
  0xee   :  { %v411_v28 = vsub.f32 %v388_v31, %v2451_v36  ;;  %v412_v56 = vsub.f32 %v388_v31, %v2452_v13  ;;  %v413_v11 = vsub.f32 %v388_v31, %v2453_v33  ;;  %v2457_v37 = vmax.f32 %v1936_v19, %v2000_v42 }
  0xef   :  { %v414_v1 = vsub.f32 %v388_v31, %v2454_v34  ;;  %v377_v51 = vmax.f32 %v2455_v58, %v373_v29  ;;  %v378_v15 = vmax.f32 %v2456_v30, %v374_v57  ;;  %v380_v6 = vmin.f32 %v341_v2, %v372_v62 }
  0xf0   :  { %v379_v38 = vmax.f32 %v2457_v37, %v375_v8  ;;  %v381_v10 = vmin.f32 %v342_v0, %v373_v29  ;;  %v382_v24 = vmin.f32 %v343_v44, %v374_v57  ;;  %v383_v26 = vmin.f32 %v344_v40, %v375_v8  ;;  %v2467_v57 = vld [vmem:[#allocation12_spill] sm:$0xff] }
  0xf1   :  { %v2458_v16 = vrot.slane %v1682_v5, %v1500_v20  ;;  %v2459_v4 = vrot.slane %v1682_v5, %v1502_v21  ;;  %v2460_v18 = vrot.slane %v1682_v5, %v1504_v22  ;;  %v2461_v19 = vrot.slane %v1682_v5, %v1506_v23 }
  0xf2   :  { %v415_v45 = vmax.f32 %v376_v27, %v411_v28  ;;  %v416_v63 = vmax.f32 %v377_v51, %v412_v56  ;;  %v417_v17 = vmax.f32 %v378_v15, %v413_v11  ;;  %v418_v41 = vmax.f32 %v379_v38, %v414_v1  ;;  %v1080_v15 = vpop.permute.xlu0 %1079 }
  0xf3   :  { %v450_v49 = vsub.f32 %v427_v61, %v2458_v16  ;;  %v451_v46 = vsub.f32 %v427_v61, %v2459_v4  ;;  %v452_v54 = vsub.f32 %v427_v61, %v2460_v18  ;;  %v453_v42 = vsub.f32 %v427_v61, %v2461_v19  ;;  %v2472_v19 = vld [vmem:[#allocation13_spill] sm:$0xff] }
  0xf4   :  { %v2463_v3 = vrot.slane %v2462_v7, %v1500_v20  ;;  %v2464_v2 = vrot.slane %v2462_v7, %v1502_v21  ;;  %v2465_v44 = vrot.slane %v2462_v7, %v1504_v22  ;;  %v2466_v5 = vrot.slane %v2462_v7, %v1506_v23  ;;  %v2477_v7 = vld [vmem:[#allocation14_spill] sm:$0xff] }
  0xf5   :  { %v419_v62 = vmin.f32 %v380_v6, %v411_v28  ;;  %v420_v50 = vmin.f32 %v381_v10, %v412_v56  ;;  %v421_v29 = vmin.f32 %v382_v24, %v413_v11  ;;  %v422_v39 = vmin.f32 %v383_v26, %v414_v1  ;;  %v466_v24 = vpop.permute.xlu1 %465 }
  0xf6   :  { %v1027_v55 = vsub.f32 %v1004_v25, %v2463_v3  ;;  %v1028_v0 = vsub.f32 %v1004_v25, %v2464_v2  ;;  %v1029_v40 = vsub.f32 %v1004_v25, %v2465_v44  ;;  %v1030_v31 = vsub.f32 %v1004_v25, %v2466_v5 }
  0xf7   :  { %v2468_v52 = vrot.slane %v2467_v57, %v1500_v20  ;;  %v2469_v36 = vrot.slane %v2467_v57, %v1502_v21  ;;  %v2470_v33 = vrot.slane %v2467_v57, %v1504_v22  ;;  %v2471_v61 = vrot.slane %v2467_v57, %v1506_v23  ;;  %v2482_v57 = vld [vmem:[#allocation15_spill] sm:$0xff] }
  0xf8   :  { %v454_v28 = vmax.f32 %v415_v45, %v450_v49  ;;  %v455_v56 = vmax.f32 %v416_v63, %v451_v46  ;;  %v456_v11 = vmax.f32 %v417_v17, %v452_v54  ;;  %v457_v1 = vmax.f32 %v418_v41, %v453_v42 }
  0xf9   :  { %v1065_v8 = vsub.f32 %v1042_v14, %v2468_v52  ;;  %v1066_v13 = vsub.f32 %v1042_v14, %v2469_v36  ;;  %v1067_v34 = vsub.f32 %v1042_v14, %v2470_v33  ;;  %v1068_v25 = vsub.f32 %v1042_v14, %v2471_v61 }
  0xfa   :  { %v1031_v27 = vmax.f32 %v993_v9, %v1027_v55  ;;  %v1032_v58 = vmax.f32 %v994_v53, %v1028_v0  ;;  %v1033_v51 = vmax.f32 %v995_v48, %v1029_v40  ;;  %v1034_v30 = vmax.f32 %v996_v60, %v1030_v31 }
  0xfb   :  { %v458_v37 = vmin.f32 %v419_v62, %v450_v49  ;;  %v459_v38 = vmin.f32 %v420_v50, %v451_v46  ;;  %v460_v6 = vmin.f32 %v421_v29, %v452_v54  ;;  %v461_v10 = vmin.f32 %v422_v39, %v453_v42 }
  0xfc   :  { %v2158_v26 = vmax.f32 %v1031_v27, %v1065_v8  ;;  %v2160_v16 = vmax.f32 %v1032_v58, %v1066_v13  ;;  %v2162_v4 = vmax.f32 %v1033_v51, %v1067_v34  ;;  %v2164_v18 = vmax.f32 %v1034_v30, %v1068_v25  ;;  %v544_v27 = vpop.permute.xlu0 %543 }
  0xfd   :  { %v2473_v9 = vrot.slane %v2472_v19, %v1500_v20  ;;  %v2474_v48 = vrot.slane %v2472_v19, %v1502_v21  ;;  %v2475_v49 = vrot.slane %v2472_v19, %v1504_v22  ;;  %v2476_v54 = vrot.slane %v2472_v19, %v1506_v23  ;;  %v2487_v19 = vld [vmem:[#allocation16_spill] sm:$0xff] }
  0xfe   :  { %v1035_v45 = vmin.f32 %v2090_v12, %v1027_v55  ;;  %v1036_v63 = vmin.f32 %v2092_v47, %v1028_v0  ;;  %v1037_v17 = vmin.f32 %v2094_v43, %v1029_v40  ;;  %v1038_v41 = vmin.f32 %v2096_v35, %v1030_v31  ;;  %v505_v40 = vpop.permute.xlu1 %504 }
  0xff   :  { %v2169_v53 = vsub.f32 %v1080_v15, %v2473_v9  ;;  %v2174_v60 = vsub.f32 %v1080_v15, %v2474_v48  ;;  %v2179_v46 = vsub.f32 %v1080_v15, %v2475_v49  ;;  %v2184_v42 = vsub.f32 %v1080_v15, %v2476_v54 }
 0x100   :  { %v2478_v3 = vrot.slane %v2477_v7, %v1500_v20  ;;  %v2479_v44 = vrot.slane %v2477_v7, %v1502_v21  ;;  %v2480_v14 = vrot.slane %v2477_v7, %v1504_v22  ;;  %v2481_v12 = vrot.slane %v2477_v7, %v1506_v23 }
 0x101   :  { %v1073_v55 = vmin.f32 %v1035_v45, %v1065_v8  ;;  %v1074_v43 = vmin.f32 %v1036_v63, %v1066_v13  ;;  %v1075_v0 = vmin.f32 %v1037_v17, %v1067_v34  ;;  %v1076_v35 = vmin.f32 %v1038_v41, %v1068_v25 }
 0x102   :  { %v489_v2 = vsub.f32 %v466_v24, %v2478_v3  ;;  %v490_v5 = vsub.f32 %v466_v24, %v2479_v44  ;;  %v491_v62 = vsub.f32 %v466_v24, %v2480_v14  ;;  %v492_v47 = vsub.f32 %v466_v24, %v2481_v12  ;;  %v2492_v14 = vld [vmem:[#allocation17_spill] sm:$0xff] }
 0x103   :  { %v1107_v31 = vmax.f32 %v2158_v26, %v2169_v53  ;;  %v1108_v50 = vmax.f32 %v2160_v16, %v2174_v60  ;;  %v1109_v29 = vmax.f32 %v2162_v4, %v2179_v46  ;;  %v1110_v39 = vmax.f32 %v2164_v18, %v2184_v42  ;;  %v1118_v18 = vpop.permute.xlu1 %1117 }
 0x104   :  { %v2483_v52 = vrot.slane %v2482_v57, %v1500_v20  ;;  %v2484_v36 = vrot.slane %v2482_v57, %v1502_v21  ;;  %v2485_v33 = vrot.slane %v2482_v57, %v1504_v22  ;;  %v2486_v61 = vrot.slane %v2482_v57, %v1506_v23 }
 0x105   :  { %v493_v58 = vmax.f32 %v454_v28, %v489_v2  ;;  %v494_v51 = vmax.f32 %v455_v56, %v490_v5  ;;  %v495_v30 = vmax.f32 %v456_v11, %v491_v62  ;;  %v496_v15 = vmax.f32 %v457_v1, %v492_v47 }
 0x106   :  { %v528_v8 = vsub.f32 %v505_v40, %v2483_v52  ;;  %v529_v13 = vsub.f32 %v505_v40, %v2484_v36  ;;  %v530_v34 = vsub.f32 %v505_v40, %v2485_v33  ;;  %v531_v25 = vsub.f32 %v505_v40, %v2486_v61  ;;  %v2497_v52 = vld [vmem:[#allocation19_spill] sm:$0xff] }
 0x107   :  { %v497_v24 = vmin.f32 %v458_v37, %v489_v2  ;;  %v498_v26 = vmin.f32 %v459_v38, %v490_v5  ;;  %v499_v16 = vmin.f32 %v460_v6, %v491_v62  ;;  %v500_v4 = vmin.f32 %v461_v10, %v492_v47  ;;  %v1194_v5 = vpop.permute.xlu0 %1193 }
 0x108   :  { %v2488_v9 = vrot.slane %v2487_v19, %v1500_v20  ;;  %v2489_v49 = vrot.slane %v2487_v19, %v1502_v21  ;;  %v2490_v28 = vrot.slane %v2487_v19, %v1504_v22  ;;  %v2491_v11 = vrot.slane %v2487_v19, %v1506_v23 }
 0x109   :  { %v2242_v37 = vmax.f32 %v493_v58, %v528_v8  ;;  %v2244_v38 = vmax.f32 %v494_v51, %v529_v13  ;;  %v2246_v6 = vmax.f32 %v495_v30, %v530_v34  ;;  %v2248_v10 = vmax.f32 %v496_v15, %v531_v25  ;;  %v2502_v58 = vld [vmem:[#allocation18_spill] sm:$0xff] }
 0x10a   :  { %v2225_v48 = vsub.f32 %v544_v27, %v2488_v9  ;;  %v2230_v54 = vsub.f32 %v544_v27, %v2489_v49  ;;  %v2235_v56 = vsub.f32 %v544_v27, %v2490_v28  ;;  %v2240_v1 = vsub.f32 %v544_v27, %v2491_v11 }
 0x10b   :  { %v1111_v45 = vmin.f32 %v1073_v55, %v2169_v53  ;;  %v1112_v63 = vmin.f32 %v1074_v43, %v2174_v60  ;;  %v1113_v17 = vmin.f32 %v1075_v0, %v2179_v46  ;;  %v1114_v41 = vmin.f32 %v1076_v35, %v2184_v42  ;;  %v1156_v43 = vpop.permute.xlu1 %1155 }
 0x10c   :  { %v2254_v7 = vmin.f32 %v497_v24, %v528_v8  ;;  %v2256_v3 = vmin.f32 %v498_v26, %v529_v13  ;;  %v2258_v2 = vmin.f32 %v499_v16, %v530_v34  ;;  %v2260_v44 = vmin.f32 %v500_v4, %v531_v25 }
 0x10d   :  { %v2493_v62 = vrot.slane %v2492_v14, %v1500_v20  ;;  %v2494_v53 = vrot.slane %v2492_v14, %v1502_v21  ;;  %v2495_v46 = vrot.slane %v2492_v14, %v1504_v22  ;;  %v2496_v47 = vrot.slane %v2492_v14, %v1506_v23 }
 0x10e   :  { %v571_v0 = vmax.f32 %v2242_v37, %v2225_v48  ;;  %v572_v35 = vmax.f32 %v2244_v38, %v2230_v54  ;;  %v573_v40 = vmax.f32 %v2246_v6, %v2235_v56  ;;  %v574_v57 = vmax.f32 %v2248_v10, %v2240_v1 }
 0x10f   :  { %v1141_v12 = vsub.f32 %v1118_v18, %v2493_v62  ;;  %v1142_v60 = vsub.f32 %v1118_v18, %v2494_v53  ;;  %v1143_v42 = vsub.f32 %v1118_v18, %v2495_v46  ;;  %v1144_v55 = vsub.f32 %v1118_v18, %v2496_v47  ;;  %v583_v10 = vpop.permute.xlu1 %582 }
 0x110   :  { %v2498_v8 = vrot.slane %v2497_v52, %v1500_v20  ;;  %v2499_v13 = vrot.slane %v2497_v52, %v1502_v21  ;;  %v2500_v34 = vrot.slane %v2497_v52, %v1504_v22  ;;  %v2501_v25 = vrot.slane %v2497_v52, %v1506_v23 }
 0x111   :  { %v2503_v51 = vrot.slane %v2502_v58, %v1500_v20  ;;  %v2504_v15 = vrot.slane %v2502_v58, %v1502_v21  ;;  %v2505_v26 = vrot.slane %v2502_v58, %v1504_v22  ;;  %v2506_v4 = vrot.slane %v2502_v58, %v1506_v23 }
 0x112   :  { %v1217_v36 = vsub.f32 %v1194_v5, %v2498_v8  ;;  %v1218_v33 = vsub.f32 %v1194_v5, %v2499_v13  ;;  %v1219_v61 = vsub.f32 %v1194_v5, %v2500_v34  ;;  %v1220_v27 = vsub.f32 %v1194_v5, %v2501_v25 }
 0x113   :  { %v1179_v30 = vsub.f32 %v1156_v43, %v2503_v51  ;;  %v1180_v24 = vsub.f32 %v1156_v43, %v2504_v15  ;;  %v1181_v16 = vsub.f32 %v1156_v43, %v2505_v26  ;;  %v1182_v18 = vsub.f32 %v1156_v43, %v2506_v4 }
 0x114   :  { %v1145_v19 = vmax.f32 %v1107_v31, %v1141_v12  ;;  %v1146_v9 = vmax.f32 %v1108_v50, %v1142_v60  ;;  %v1147_v49 = vmax.f32 %v1109_v29, %v1143_v42  ;;  %v1148_v28 = vmax.f32 %v1110_v39, %v1144_v55  ;;  %v2507_v39 = vld [vmem:[#allocation20_spill] sm:$0xff] }
 0x115   :  { %v1149_v11 = vmin.f32 %v1111_v45, %v1141_v12  ;;  %v1150_v37 = vmin.f32 %v1112_v63, %v1142_v60  ;;  %v1151_v38 = vmin.f32 %v1113_v17, %v1143_v42  ;;  %v1152_v6 = vmin.f32 %v1114_v41, %v1144_v55 }
 0x116   :  { %v1183_v5 = vmax.f32 %v1145_v19, %v1179_v30  ;;  %v1184_v14 = vmax.f32 %v1146_v9, %v1180_v24  ;;  %v1185_v62 = vmax.f32 %v1147_v49, %v1181_v16  ;;  %v1186_v53 = vmax.f32 %v1148_v28, %v1182_v18 }
 0x117   :  { %v1187_v46 = vmin.f32 %v1149_v11, %v1179_v30  ;;  %v1188_v47 = vmin.f32 %v1150_v37, %v1180_v24  ;;  %v1189_v52 = vmin.f32 %v1151_v38, %v1181_v16  ;;  %v1190_v8 = vmin.f32 %v1152_v6, %v1182_v18 }
 0x118   :  { %v575_v43 = vmin.f32 %v2254_v7, %v2225_v48  ;;  %v576_v31 = vmin.f32 %v2256_v3, %v2230_v54  ;;  %v577_v50 = vmin.f32 %v2258_v2, %v2235_v56  ;;  %v578_v29 = vmin.f32 %v2260_v44, %v2240_v1  ;;  %v622_v44 = vpop.permute.xlu1 %621 }
 0x119   :  { %v2508_v45 = vrot.slane %v2507_v39, %v1500_v20  ;;  %v2509_v17 = vrot.slane %v2507_v39, %v1502_v21  ;;  %v2510_v48 = vrot.slane %v2507_v39, %v1504_v22  ;;  %v2511_v54 = vrot.slane %v2507_v39, %v1506_v23 }
 0x11a   :  { %v1221_v56 = vmax.f32 %v1183_v5, %v1217_v36  ;;  %v1222_v2 = vmax.f32 %v1184_v14, %v1218_v33  ;;  %v1223_v12 = vmax.f32 %v1185_v62, %v1219_v61  ;;  %v1224_v1 = vmax.f32 %v1186_v53, %v1220_v27 }
 0x11b   :  { %v606_v63 = vsub.f32 %v583_v10, %v2508_v45  ;;  %v607_v41 = vsub.f32 %v583_v10, %v2509_v17  ;;  %v608_v7 = vsub.f32 %v583_v10, %v2510_v48  ;;  %v609_v3 = vsub.f32 %v583_v10, %v2511_v54 }
 0x11c   :  { %v1225_v60 = vmin.f32 %v1187_v46, %v1217_v36  ;;  %v1226_v42 = vmin.f32 %v1188_v47, %v1218_v33  ;;  %v1227_v55 = vmin.f32 %v1189_v52, %v1219_v61  ;;  %v1228_v13 = vmin.f32 %v1190_v8, %v1220_v27  ;;  %v1232_v61 = vpop.permute.xlu1 %1231 }
 0x11d   :  { %v610_v34 = vmax.f32 %v571_v0, %v606_v63  ;;  %v611_v25 = vmax.f32 %v572_v35, %v607_v41  ;;  %v612_v58 = vmax.f32 %v573_v40, %v608_v7  ;;  %v613_v51 = vmax.f32 %v574_v57, %v609_v3 }
 0x11e   :  { %v2512_v30 = vrot.slane %v1886_v59, %v1500_v20  ;;  %v2513_v24 = vrot.slane %v1886_v59, %v1502_v21  ;;  %v2514_v16 = vrot.slane %v1886_v59, %v1504_v22  ;;  %v2515_v36 = vrot.slane %v1886_v59, %v1506_v23 }
 0x11f   :  { %v614_v0 = vmin.f32 %v575_v43, %v606_v63  ;;  %v615_v35 = vmin.f32 %v576_v31, %v607_v41  ;;  %v616_v40 = vmin.f32 %v577_v50, %v608_v7  ;;  %v617_v57 = vmin.f32 %v578_v29, %v609_v3 }
 0x120   :  { %v645_v15 = vsub.f32 %v622_v44, %v2512_v30  ;;  %v646_v26 = vsub.f32 %v622_v44, %v2513_v24  ;;  %v647_v4 = vsub.f32 %v622_v44, %v2514_v16  ;;  %v648_v33 = vsub.f32 %v622_v44, %v2515_v36 }
 0x121   :  { %v2516_v38 = vrot.slane %v1888_v32, %v1500_v20  ;;  %v2517_v59 = vrot.slane %v1888_v32, %v1502_v21  ;;  %v2518_v5 = vrot.slane %v1888_v32, %v1504_v22  ;;  %v2519_v62 = vrot.slane %v1888_v32, %v1506_v23 }
 0x122   :  { %v649_v27 = vmax.f32 %v610_v34, %v645_v15  ;;  %v650_v18 = vmax.f32 %v611_v25, %v646_v26  ;;  %v651_v19 = vmax.f32 %v612_v58, %v647_v4  ;;  %v652_v9 = vmax.f32 %v613_v51, %v648_v33 }
 0x123   :  { %v653_v49 = vmin.f32 %v614_v0, %v645_v15  ;;  %v654_v28 = vmin.f32 %v615_v35, %v646_v26  ;;  %v655_v11 = vmin.f32 %v616_v40, %v647_v4  ;;  %v656_v37 = vmin.f32 %v617_v57, %v648_v33 }
 0x124   :  { %v1255_v6 = vsub.f32 %v1232_v61, %v2516_v38  ;;  %v1256_v10 = vsub.f32 %v1232_v61, %v2517_v59  ;;  %v1257_v14 = vsub.f32 %v1232_v61, %v2518_v5  ;;  %v1258_v53 = vsub.f32 %v1232_v61, %v2519_v62 }
 0x125   :  { %v657_v46 = vsub.f32 %v649_v27, %v653_v49  ;;  %v658_v47 = vsub.f32 %v650_v18, %v654_v28  ;;  %v659_v52 = vsub.f32 %v651_v19, %v655_v11  ;;  %v660_v8 = vsub.f32 %v652_v9, %v656_v37 }
 0x126   :  { %v1259_v43 = vmax.f32 %v1221_v56, %v1255_v6  ;;  %v1260_v31 = vmax.f32 %v1222_v2, %v1256_v10  ;;  %v1261_v20 = vmax.f32 %v1223_v12, %v1257_v14  ;;  %v1262_v50 = vmax.f32 %v1224_v1, %v1258_v53 }
 0x127   :  { %661 = vst [vmem:[#allocation7] sm:$0xff] %v657_v46  ;;  %662 = vst [vmem:[#allocation7 + $0x8] sm:$0xff] %v658_v47  ;;  %v1263_v21 = vmin.f32 %v1225_v60, %v1255_v6  ;;  %v1264_v22 = vmin.f32 %v1226_v42, %v1256_v10  ;;  %v1265_v29 = vmin.f32 %v1227_v55, %v1257_v14 }
 0x128   :  { %663 = vst [vmem:[#allocation7 + $0x10] sm:$0xff] %v659_v52  ;;  %664 = vst [vmem:[#allocation7 + $0x18] sm:$0xff] %v660_v8  ;;  %v1266_v39 = vmin.f32 %v1228_v13, %v1258_v53 }
 0x129   :  { %v1267_v23 = vsub.f32 %v1259_v43, %v1263_v21  ;;  %v1268_v32 = vsub.f32 %v1260_v31, %v1264_v22  ;;  %v1269_v45 = vsub.f32 %v1261_v20, %v1265_v29 }
 0x12a   :  { %v1270_v63 = vsub.f32 %v1262_v50, %v1266_v39 }
 0x12b   :  { %1271 = vst [vmem:[#allocation7 + $0x20] sm:$0xff] %v1267_v23  ;;  %1272 = vst [vmem:[#allocation7 + $0x28] sm:$0xff] %v1268_v32 }
 0x12c   :  { %1273 = vst [vmem:[#allocation7 + $0x30] sm:$0xff] %v1269_v45  ;;  %1274 = vst [vmem:[#allocation7 + $0x38] sm:$0xff] %v1270_v63 }
 0x12d   :  { %1400 = shalt.err (!%p1397_p6)
}
 0x12e   :  { %s1401_s12 = scalar_lea.hbm %s2367_s2, 1024 }
 0x12f   :  { %p1402_p7 = scmp.ne.s32.totalorder %s2367_s2, %s1401_s12  ;;  %p1405_p8 = scmp.lt.u32.totalorder %s1401_s12, %s2367_s2 }
 0x131   :  { %p1407_p9 = pnand %p1405_p8, %p1402_p7 }
 0x133   :  { %1410 = shalt.err (!%p1407_p9)
}
 0x134   :  { %1286 = dma.vmem_to_hbm [thread:$0]  %s1281_s8, 1024, %s2367_s2, [#allocation4], %s1421_s0, %s1421_s0, %s1422_s5  }
 0x135   :  { %1415 = dma.done.wait [#allocation4], 1024  }
 0x136   :  { %1416 = vsyncadd [#allocation4], 4294966272 }
 0x137   :  { %1290 = vsyncpa [#allocation3], 1 }
 0x138   :  { %1291 = vsyncpa [#allocation6], 1 }
 0x139   :  { %1292 = vsyncpa [#allocation4], 1 }

</bundles_post_ra>
